<compile_context>
chip_gen: v5e
topology: v5e:2x2
jax: 0.10.0
libtpu: 0.0.40
codegen_flags: <defaults>
</compile_context>

<pallas_src>
import functools

import jax
import jax.numpy as jnp
from jax.experimental import pallas as pl
from jax.experimental.pallas import tpu as pltpu


def _round_up(x, m):
    return (x + m - 1) // m * m


def _pad_cols(a, cols):
    pad = cols - a.shape[-1]
    if pad == 0:
        return a
    return jnp.pad(a, ((0, 0), (0, pad)))


def _pad_rows_cols(a, rows, cols):
    return jnp.pad(a, ((0, rows - a.shape[0]), (0, cols - a.shape[1])))


def _pick_batch_tile(bs, n_zones, max_rows=512):
    """Largest batch tile TB dividing bs with TB * n_zones <= max_rows.

    Falls back to the whole batch (single grid step) when no multiple-of-8
    divisor fits — the full dim is always a legal block shape.
    """
    if bs * n_zones <= max_rows:
        return bs
    cap = max(8, (max_rows // max(n_zones, 1)) // 8 * 8)
    for t in range(min(cap, bs), 7, -8):
        if bs % t == 0:
            return t
    return bs


def zone_env_kernel(obs_ref, zone_ref,
                    w1o_ref, w1z_ref, b1_ref,
                    w2_ref, b2_ref, w3_ref, b3_ref,
                    wco_ref, wce_ref, bc_ref,
                    out_ref, *, n_zones):
    tb, _ = obs_ref.shape
    hp = b1_ref.shape[-1]

    obs = obs_ref[...]

    # Layer 1, obs part: computed once per batch row (not once per zone).
    h_obs = (jnp.dot(obs, w1o_ref[...], preferred_element_type=jnp.float32)
             + b1_ref[...])                                        # (TB, Hp)
    # Repeat each batch row n_zones times so rows align with zone_ref.
    # With n_zones == 8 this reshape is layout-preserving (one sublane tile).
    h_obs_rep = jnp.broadcast_to(
        h_obs[:, None, :], (tb, n_zones, hp)).reshape(tb * n_zones, hp)

    # Zone MLP: (layer1 zone part + ReLU) -> (layer2 + ReLU) -> layer3.
    z = jnp.dot(zone_ref[...], w1z_ref[...],
                preferred_element_type=jnp.float32)                # (TB*N, Hp)
    z = jnp.maximum(z + h_obs_rep, 0.0)
    z = jnp.maximum(
        jnp.dot(z, w2_ref[...], preferred_element_type=jnp.float32)
        + b2_ref[...], 0.0)
    z = (jnp.dot(z, w3_ref[...], preferred_element_type=jnp.float32)
         + b3_ref[...])

    # Block-diagonal mean over zones: re-block and reduce the sublane axis on
    # the XLU (no dense averaging matrix, no wasted MXU cycles).
    zone_emb = z.reshape(tb, n_zones, hp).sum(axis=1) * (1.0 / n_zones)

    # combine_net_: Linear on cat([obs, zone_emb], -1), weight pre-split.
    out_ref[...] = (
        jnp.dot(obs, wco_ref[...], preferred_element_type=jnp.float32)
        + jnp.dot(zone_emb, wce_ref[...], preferred_element_type=jnp.float32)
        + bc_ref[...])


def zone_env_model_forward(obs, zone_obs, params, *, max_rows_per_step=512):
    """obs: (B, obs_size), zone_obs: (B, N, zone_size) -> (B, h_dim)."""
    bs, obs_size = obs.shape
    _, n_zones, zone_size = zone_obs.shape
    h_dim = params["b1"].shape[-1]
    hp = _round_up(h_dim, 128)          # lane-dense hidden / output width

    # Split w1 into obs / zone parts (so obs is never repeated + concatenated
    # in HBM) and zero-pad every h_dim axis up to hp.  Pad columns stay exactly
    # zero through every layer, so slicing the output afterwards is exact.
    w1o = _pad_cols(params["w1"][:obs_size], hp)
    w1z = _pad_cols(params["w1"][obs_size:], hp)
    b1 = _pad_cols(params["b1"], hp)
    w2 = _pad_rows_cols(params["w2"], hp, hp)
    b2 = _pad_cols(params["b2"], hp)
    w3 = _pad_rows_cols(params["w3"], hp, hp)
    b3 = _pad_cols(params["b3"], hp)
    wco = _pad_cols(params["wc_obs"], hp)
    wce = _pad_rows_cols(params["wc_emb"], hp, hp)
    bc = _pad_cols(params["bc"], hp)

    # (B, N, Z) -> (B*N, Z): contiguous row-major, free reshape done by XLA.
    zone_flat = zone_obs.reshape(bs * n_zones, zone_size)

    tb = _pick_batch_tile(bs, n_zones, max_rows_per_step)
    grid = (bs // tb,)

    def const_spec(x):
        # Constant index map -> the (tiny) weights stay VMEM-resident across
        # grid steps; only activation tiles flow through the pipeline.
        return pl.BlockSpec(x.shape, lambda i: (0, 0))

    out = pl.pallas_call(
        functools.partial(zone_env_kernel, n_zones=n_zones),
        out_shape=jax.ShapeDtypeStruct((bs, hp), jnp.float32),
        grid=grid,
        in_specs=[
            pl.BlockSpec((tb, obs_size), lambda i: (i, 0)),
            pl.BlockSpec((tb * n_zones, zone_size), lambda i: (i, 0)),
            const_spec(w1o), const_spec(w1z), const_spec(b1),
            const_spec(w2), const_spec(b2),
            const_spec(w3), const_spec(b3),
            const_spec(wco), const_spec(wce), const_spec(bc),
        ],
        out_specs=pl.BlockSpec((tb, hp), lambda i: (i, 0)),
        compiler_params=pltpu.CompilerParams(
            dimension_semantics=("parallel",),
            vmem_limit_bytes=32 * 1024 * 1024),
    )(obs, zone_flat, w1o, w1z, b1, w2, b2, w3, b3, wco, wce, bc)

    return out[:, :h_dim]


def init_params(key, obs_size, zone_size, h_dim):
    """Deterministic synthetic parameters; weights stored as (in, out)."""
    ks = jax.random.split(key, 8)
    d_in = obs_size + zone_size

    def w(k, fin, fout):
        return (jax.random.normal(k, (fin, fout), jnp.float32)
                / jnp.sqrt(jnp.float32(fin)))

    return {
        "w1": w(ks[0], d_in, h_dim),
        "b1": jax.random.normal(ks[1], (1, h_dim), jnp.float32) * 0.01,
        "w2": w(ks[2], h_dim, h_dim),
        "b2": jax.random.normal(ks[3], (1, h_dim), jnp.float32) * 0.01,
        "w3": w(ks[4], h_dim, h_dim),
        "b3": jax.random.normal(ks[5], (1, h_dim), jnp.float32) * 0.01,
        # combine_net_ weight split into obs-part and zone_emb-part
        "wc_obs": w(ks[6], obs_size, h_dim),
        "wc_emb": w(ks[7], h_dim, h_dim),
        "bc": jnp.zeros((1, h_dim), jnp.float32),
    }


def reference_forward(obs, zone_obs, params):
    """Pure-JAX reference mirroring the PyTorch module."""
    bs, obs_size = obs.shape
    _, n_zones, _ = zone_obs.shape
    obs_rep = jnp.broadcast_to(obs[:, None, :], (bs, n_zones, obs_size))
    x = jnp.concatenate([obs_rep, zone_obs], axis=-1)
    h = jnp.maximum(x @ params["w1"] + params["b1"], 0.0)
    h = jnp.maximum(h @ params["w2"] + params["b2"], 0.0)
    h = h @ params["w3"] + params["b3"]
    zone_emb = h.sum(axis=1) / n_zones
    return obs @ params["wc_obs"] + zone_emb @ params["wc_emb"] + params["bc"]


if __name__ == "__main__":
    key = jax.random.PRNGKey(0)
    k_obs, k_zone, k_param = jax.random.split(key, 3)

    # obs_space = {'obs': (obs_size,), 'zone_obs': (n_zones, zone_size)}
    bs, n_zones = 2, 8
    obs_size, zone_size, h_dim = 4, 4, 32

    obs = jax.random.normal(k_obs, (bs, obs_size), jnp.float32)
    zone_obs = jax.random.normal(k_zone, (bs, n_zones, zone_size), jnp.float32)
    params = init_params(k_param, obs_size, zone_size, h_dim)

    out = zone_env_model_forward(obs, zone_obs, params)
    out = jax.block_until_ready(out)
    ref = reference_forward(obs, zone_obs, params)
    assert out.shape == (bs, h_dim)
    assert jnp.allclose(out, ref, atol=1e-5, rtol=1e-5)

    # Larger batch to exercise the row-tiled (grid > 1) pipelined path.
    bs2 = 128
    k_obs2, k_zone2 = jax.random.split(jax.random.PRNGKey(1), 2)
    obs2 = jax.random.normal(k_obs2, (bs2, obs_size), jnp.float32)
    zone_obs2 = jax.random.normal(k_zone2, (bs2, n_zones, zone_size),
                                  jnp.float32)
    out2 = jax.block_until_ready(zone_env_model_forward(obs2, zone_obs2, params))
    ref2 = reference_forward(obs2, zone_obs2, params)
    assert out2.shape == (bs2, h_dim)
    assert jnp.allclose(out2, ref2, atol=1e-5, rtol=1e-5)

    print("KERNEL_OK")
</pallas_src>

<mosaic_0001>
module attributes {stable_mosaic.version = 11 : i64} {
  func.func @zone_env_kernel(%arg0: i32, %arg1: memref<2x4xf32, #tpu.memory_space<vmem>>, %arg2: memref<16x4xf32, #tpu.memory_space<vmem>>, %arg3: memref<4x128xf32, #tpu.memory_space<vmem>>, %arg4: memref<4x128xf32, #tpu.memory_space<vmem>>, %arg5: memref<1x128xf32, #tpu.memory_space<vmem>>, %arg6: memref<128x128xf32, #tpu.memory_space<vmem>>, %arg7: memref<1x128xf32, #tpu.memory_space<vmem>>, %arg8: memref<128x128xf32, #tpu.memory_space<vmem>>, %arg9: memref<1x128xf32, #tpu.memory_space<vmem>>, %arg10: memref<4x128xf32, #tpu.memory_space<vmem>>, %arg11: memref<128x128xf32, #tpu.memory_space<vmem>>, %arg12: memref<1x128xf32, #tpu.memory_space<vmem>>, %arg13: memref<2x128xf32, #tpu.memory_space<vmem>>) attributes {dimension_semantics = [#tpu.dimension_semantics<parallel>], iteration_bounds = array<i64: 1>, scalar_prefetch = 0 : i64, scratch_operands = 0 : i64, tpu.core_type = #tpu.core_type<tc>, window_params = [{transform_indices = @transform_0, window_bounds = array<i64: 2, 4>}, {transform_indices = @transform_1, window_bounds = array<i64: 16, 4>}, {pipeline_mode = #tpu.pipeline_mode<synchronous>, transform_indices = @transform_2, window_bounds = array<i64: 4, 128>}, {pipeline_mode = #tpu.pipeline_mode<synchronous>, transform_indices = @transform_3, window_bounds = array<i64: 4, 128>}, {pipeline_mode = #tpu.pipeline_mode<synchronous>, transform_indices = @transform_4, window_bounds = array<i64: 1, 128>}, {pipeline_mode = #tpu.pipeline_mode<synchronous>, transform_indices = @transform_5, window_bounds = array<i64: 128, 128>}, {pipeline_mode = #tpu.pipeline_mode<synchronous>, transform_indices = @transform_6, window_bounds = array<i64: 1, 128>}, {pipeline_mode = #tpu.pipeline_mode<synchronous>, transform_indices = @transform_7, window_bounds = array<i64: 128, 128>}, {pipeline_mode = #tpu.pipeline_mode<synchronous>, transform_indices = @transform_8, window_bounds = array<i64: 1, 128>}, {pipeline_mode = #tpu.pipeline_mode<synchronous>, transform_indices = @transform_9, window_bounds = array<i64: 4, 128>}, {pipeline_mode = #tpu.pipeline_mode<synchronous>, transform_indices = @transform_10, window_bounds = array<i64: 128, 128>}, {pipeline_mode = #tpu.pipeline_mode<synchronous>, transform_indices = @transform_11, window_bounds = array<i64: 1, 128>}, {transform_indices = @transform_12, window_bounds = array<i64: 2, 128>}]} {
    %c0 = arith.constant 0 : index
    %c0_0 = arith.constant 0 : index
    %0 = vector.load %arg1[%c0, %c0_0] : memref<2x4xf32, #tpu.memory_space<vmem>>, vector<2x4xf32>
    %c0_1 = arith.constant 0 : index
    %c0_2 = arith.constant 0 : index
    %1 = vector.load %arg3[%c0_1, %c0_2] : memref<4x128xf32, #tpu.memory_space<vmem>>, vector<4x128xf32>
    %cst = arith.constant dense<0.000000e+00> : vector<2x128xf32>
    %2 = tpu.matmul %0, %1, %cst {dimension_numbers = #tpu.dot_dimension_numbers<[1], [0], [0], [1], [0, 0, 1, 1], [], []>} : vector<2x4xf32>, vector<4x128xf32>, vector<2x128xf32> -> vector<2x128xf32>
    %c0_3 = arith.constant 0 : index
    %c0_4 = arith.constant 0 : index
    %3 = vector.load %arg5[%c0_3, %c0_4] : memref<1x128xf32, #tpu.memory_space<vmem>>, vector<1x128xf32>
    %4 = vector.broadcast %3 : vector<1x128xf32> to vector<2x128xf32>
    %5 = arith.addf %2, %4 : vector<2x128xf32>
    %6 = vector.shape_cast %5 : vector<2x128xf32> to vector<2x1x128xf32>
    %7 = vector.shape_cast %6 : vector<2x1x128xf32> to vector<2x1x128xf32>
    %8 = vector.broadcast %7 : vector<2x1x128xf32> to vector<2x8x128xf32>
    %9 = vector.shape_cast %8 : vector<2x8x128xf32> to vector<16x128xf32>
    %c0_5 = arith.constant 0 : index
    %c0_6 = arith.constant 0 : index
    %10 = vector.load %arg2[%c0_5, %c0_6] : memref<16x4xf32, #tpu.memory_space<vmem>>, vector<16x4xf32>
    %c0_7 = arith.constant 0 : index
    %c0_8 = arith.constant 0 : index
    %11 = vector.load %arg4[%c0_7, %c0_8] : memref<4x128xf32, #tpu.memory_space<vmem>>, vector<4x128xf32>
    %cst_9 = arith.constant dense<0.000000e+00> : vector<16x128xf32>
    %12 = tpu.matmul %10, %11, %cst_9 {dimension_numbers = #tpu.dot_dimension_numbers<[1], [0], [0], [1], [0, 0, 1, 1], [], []>} : vector<16x4xf32>, vector<4x128xf32>, vector<16x128xf32> -> vector<16x128xf32>
    %13 = arith.addf %12, %9 : vector<16x128xf32>
    %cst_10 = arith.constant 0.000000e+00 : f32
    %14 = vector.broadcast %cst_10 : f32 to vector<16x128xf32>
    %15 = arith.maximumf %13, %14 : vector<16x128xf32>
    %c0_11 = arith.constant 0 : index
    %c0_12 = arith.constant 0 : index
    %16 = vector.load %arg6[%c0_11, %c0_12] : memref<128x128xf32, #tpu.memory_space<vmem>>, vector<128x128xf32>
    %cst_13 = arith.constant dense<0.000000e+00> : vector<16x128xf32>
    %17 = tpu.matmul %15, %16, %cst_13 {dimension_numbers = #tpu.dot_dimension_numbers<[1], [0], [0], [1], [0, 0, 1, 1], [], []>} : vector<16x128xf32>, vector<128x128xf32>, vector<16x128xf32> -> vector<16x128xf32>
    %c0_14 = arith.constant 0 : index
    %c0_15 = arith.constant 0 : index
    %18 = vector.load %arg7[%c0_14, %c0_15] : memref<1x128xf32, #tpu.memory_space<vmem>>, vector<1x128xf32>
    %19 = vector.broadcast %18 : vector<1x128xf32> to vector<16x128xf32>
    %20 = arith.addf %17, %19 : vector<16x128xf32>
    %cst_16 = arith.constant 0.000000e+00 : f32
    %21 = vector.broadcast %cst_16 : f32 to vector<16x128xf32>
    %22 = arith.maximumf %20, %21 : vector<16x128xf32>
    %c0_17 = arith.constant 0 : index
    %c0_18 = arith.constant 0 : index
    %23 = vector.load %arg8[%c0_17, %c0_18] : memref<128x128xf32, #tpu.memory_space<vmem>>, vector<128x128xf32>
    %cst_19 = arith.constant dense<0.000000e+00> : vector<16x128xf32>
    %24 = tpu.matmul %22, %23, %cst_19 {dimension_numbers = #tpu.dot_dimension_numbers<[1], [0], [0], [1], [0, 0, 1, 1], [], []>} : vector<16x128xf32>, vector<128x128xf32>, vector<16x128xf32> -> vector<16x128xf32>
    %c0_20 = arith.constant 0 : index
    %c0_21 = arith.constant 0 : index
    %25 = vector.load %arg9[%c0_20, %c0_21] : memref<1x128xf32, #tpu.memory_space<vmem>>, vector<1x128xf32>
    %26 = vector.broadcast %25 : vector<1x128xf32> to vector<16x128xf32>
    %27 = arith.addf %24, %26 : vector<16x128xf32>
    %28 = vector.shape_cast %27 : vector<16x128xf32> to vector<2x8x128xf32>
    %cst_22 = arith.constant dense<0.000000e+00> : vector<2x128xf32>
    %29 = vector.multi_reduction <add>, %28, %cst_22 [1] : vector<2x8x128xf32> to vector<2x128xf32>
    %cst_23 = arith.constant 1.250000e-01 : f32
    %30 = vector.broadcast %cst_23 : f32 to vector<2x128xf32>
    %31 = arith.mulf %29, %30 : vector<2x128xf32>
    %c0_24 = arith.constant 0 : index
    %c0_25 = arith.constant 0 : index
    %32 = vector.load %arg10[%c0_24, %c0_25] : memref<4x128xf32, #tpu.memory_space<vmem>>, vector<4x128xf32>
    %cst_26 = arith.constant dense<0.000000e+00> : vector<2x128xf32>
    %33 = tpu.matmul %0, %32, %cst_26 {dimension_numbers = #tpu.dot_dimension_numbers<[1], [0], [0], [1], [0, 0, 1, 1], [], []>} : vector<2x4xf32>, vector<4x128xf32>, vector<2x128xf32> -> vector<2x128xf32>
    %c0_27 = arith.constant 0 : index
    %c0_28 = arith.constant 0 : index
    %34 = vector.load %arg11[%c0_27, %c0_28] : memref<128x128xf32, #tpu.memory_space<vmem>>, vector<128x128xf32>
    %cst_29 = arith.constant dense<0.000000e+00> : vector<2x128xf32>
    %35 = tpu.matmul %31, %34, %cst_29 {dimension_numbers = #tpu.dot_dimension_numbers<[1], [0], [0], [1], [0, 0, 1, 1], [], []>} : vector<2x128xf32>, vector<128x128xf32>, vector<2x128xf32> -> vector<2x128xf32>
    %36 = arith.addf %33, %35 : vector<2x128xf32>
    %c0_30 = arith.constant 0 : index
    %c0_31 = arith.constant 0 : index
    %37 = vector.load %arg12[%c0_30, %c0_31] : memref<1x128xf32, #tpu.memory_space<vmem>>, vector<1x128xf32>
    %38 = vector.broadcast %37 : vector<1x128xf32> to vector<2x128xf32>
    %39 = arith.addf %36, %38 : vector<2x128xf32>
    %c0_32 = arith.constant 0 : index
    %c0_33 = arith.constant 0 : index
    %40 = vector.load %arg13[%c0_32, %c0_33] : memref<2x128xf32, #tpu.memory_space<vmem>>, vector<2x128xf32>
    tpu.vector_store %arg13[%c0_32, %c0_33], %39 {strides = array<i32>} : memref<2x128xf32, #tpu.memory_space<vmem>>, vector<2x128xf32>,
    return
  }
  func.func @transform_0(%arg0: i32) -> (i32, i32) {
    %c0_i32 = arith.constant 0 : i32
    %c0_i32_0 = arith.constant 0 : i32
    return %arg0, %c0_i32 : i32, i32
  }
  func.func @transform_1(%arg0: i32) -> (i32, i32) {
    %c0_i32 = arith.constant 0 : i32
    %c0_i32_0 = arith.constant 0 : i32
    return %arg0, %c0_i32 : i32, i32
  }
  func.func @transform_2(%arg0: i32) -> (i32, i32) {
    %c0_i32 = arith.constant 0 : i32
    %c0_i32_0 = arith.constant 0 : i32
    %c0_i32_1 = arith.constant 0 : i32
    return %c0_i32, %c0_i32_0 : i32, i32
  }
  func.func @transform_3(%arg0: i32) -> (i32, i32) {
    %c0_i32 = arith.constant 0 : i32
    %c0_i32_0 = arith.constant 0 : i32
    %c0_i32_1 = arith.constant 0 : i32
    return %c0_i32, %c0_i32_0 : i32, i32
  }
  func.func @transform_4(%arg0: i32) -> (i32, i32) {
    %c0_i32 = arith.constant 0 : i32
    %c0_i32_0 = arith.constant 0 : i32
    %c0_i32_1 = arith.constant 0 : i32
    return %c0_i32, %c0_i32_0 : i32, i32
  }
  func.func @transform_5(%arg0: i32) -> (i32, i32) {
    %c0_i32 = arith.constant 0 : i32
    %c0_i32_0 = arith.constant 0 : i32
    %c0_i32_1 = arith.constant 0 : i32
    return %c0_i32, %c0_i32_0 : i32, i32
  }
  func.func @transform_6(%arg0: i32) -> (i32, i32) {
    %c0_i32 = arith.constant 0 : i32
    %c0_i32_0 = arith.constant 0 : i32
    %c0_i32_1 = arith.constant 0 : i32
    return %c0_i32, %c0_i32_0 : i32, i32
  }
  func.func @transform_7(%arg0: i32) -> (i32, i32) {
    %c0_i32 = arith.constant 0 : i32
    %c0_i32_0 = arith.constant 0 : i32
    %c0_i32_1 = arith.constant 0 : i32
    return %c0_i32, %c0_i32_0 : i32, i32
  }
  func.func @transform_8(%arg0: i32) -> (i32, i32) {
    %c0_i32 = arith.constant 0 : i32
    %c0_i32_0 = arith.constant 0 : i32
    %c0_i32_1 = arith.constant 0 : i32
    return %c0_i32, %c0_i32_0 : i32, i32
  }
  func.func @transform_9(%arg0: i32) -> (i32, i32) {
    %c0_i32 = arith.constant 0 : i32
    %c0_i32_0 = arith.constant 0 : i32
    %c0_i32_1 = arith.constant 0 : i32
    return %c0_i32, %c0_i32_0 : i32, i32
  }
  func.func @transform_10(%arg0: i32) -> (i32, i32) {
    %c0_i32 = arith.constant 0 : i32
    %c0_i32_0 = arith.constant 0 : i32
    %c0_i32_1 = arith.constant 0 : i32
    return %c0_i32, %c0_i32_0 : i32, i32
  }
  func.func @transform_11(%arg0: i32) -> (i32, i32) {
    %c0_i32 = arith.constant 0 : i32
    %c0_i32_0 = arith.constant 0 : i32
    %c0_i32_1 = arith.constant 0 : i32
    return %c0_i32, %c0_i32_0 : i32, i32
  }
  func.func @transform_12(%arg0: i32) -> (i32, i32) {
    %c0_i32 = arith.constant 0 : i32
    %c0_i32_0 = arith.constant 0 : i32
    return %arg0, %c0_i32 : i32, i32
  }
}

</mosaic_0001>

<bundles_post_ra>
// kernel: tpu_custom_call.1
= control target key start
LH: loop header
LB: loop body
LE: loop exit
PB: predicated region body
PF: predicated region fallthrough
CT: control target
= control target key end

     0   :  { %17 = vsyncpa [#allocation3], 0  ;;  %s600_s0 = inlined_call_operand.vmem [shape: f32[2,4], index: 0, kind: input, shape index: {}]   ;;  %s601_s1 = inlined_call_operand.vmem [shape: f32[16,4], index: 1, kind: input, shape index: {}]   ;;  %s602_s2 = inlined_call_operand.vmem [shape: f32[4,128], index: 2, kind: input, shape index: {}]   ;;  %s603_s3 = inlined_call_operand.vmem [shape: f32[4,128], index: 3, kind: input, shape index: {}]   ;;  %s604_s4 = inlined_call_operand.vmem [shape: f32[1,128], index: 4, kind: input, shape index: {}]   ;;  %s605_s5 = inlined_call_operand.hbm [shape: f32[128,128], index: 5, kind: input, shape index: {}]   ;;  %s606_s6 = inlined_call_operand.vmem [shape: f32[1,128], index: 6, kind: input, shape index: {}]   ;;  %s607_s7 = inlined_call_operand.hbm [shape: f32[128,128], index: 7, kind: input, shape index: {}]   ;;  %s608_s8 = inlined_call_operand.vmem [shape: f32[1,128], index: 8, kind: input, shape index: {}]   ;;  %s609_s9 = inlined_call_operand.vmem [shape: f32[4,128], index: 9, kind: input, shape index: {}]   ;;  %s610_s10 = inlined_call_operand.hbm [shape: f32[128,128], index: 10, kind: input, shape index: {}]   ;;  %s611_s11 = inlined_call_operand.vmem [shape: f32[1,128], index: 11, kind: input, shape index: {}]   ;;  %s612_s12 = inlined_call_operand.hbm [shape: f32[2,128], index: 12, kind: output, shape index: {}]  }
   0x1   :  { %18 = vsyncpa [#allocation6], 0 }
   0x2   :  { %19 = vsyncpa [#allocation4], 0  ;;  %s49_s23 = sshll.u32 %s607_s7, 4  ;;  %s476_s24 = smov [#allocation5]   ;;  %s50_s23 = int_to_ptr.hbm [resolvable:$true] %s49_s23 }
   0x3   :  { %s51_s25 = sshll.u32 %s476_s24, 4  ;;  %s34_s28 = sshll.u32 %s605_s5, 4  ;;  %s52_s25 = int_to_ptr.vmem [resolvable:$true] %s51_s25  ;;  %s35_s28 = int_to_ptr.hbm [resolvable:$true] %s34_s28 }
   0x4   :  { %s477_s29 = smov 128   ;;  %s478_s30 = smov 8  }
   0x5   :  { %57 = dma.hbm_to_vmem [thread:$0]  %s50_s23, 2048, %s52_s25, [#allocation6], %s477_s29, %s477_s29, %s478_s30  }
   0x6   :  { %s479_s13 = smov [#allocation2]   ;;  %s66_s17 = sshll.u32 %s610_s10, 4  ;;  %s67_s17 = int_to_ptr.hbm [resolvable:$true] %s66_s17 }
   0x7   :  { %s36_s14 = sshll.u32 %s479_s13, 4  ;;  %s480_s7 = smov [#allocation7]   ;;  %s37_s14 = int_to_ptr.vmem [resolvable:$true] %s36_s14 }
   0x8   :  { %42 = dma.hbm_to_vmem [thread:$0]  %s35_s28, 2048, %s37_s14, [#allocation3], %s477_s29, %s477_s29, %s478_s30  }
   0x9   :  { %s68_s18 = sshll.u32 %s480_s7, 4  ;;  %s69_s18 = int_to_ptr.vmem [resolvable:$true] %s68_s18 }
   0xa   :  { %74 = dma.hbm_to_vmem [thread:$0]  %s67_s17, 2048, %s69_s18, [#allocation6], %s477_s29, %s477_s29, %s478_s30  }
   0xb   :  { %470 = dma.done.wait [#allocation3], 2048  }
   0xc   :  { %471 = vsyncadd [#allocation3], 4294965248 }
   0xd   :  { %472 = dma.done.wait [#allocation6], 4096  }
   0xe   :  { %473 = vsyncadd [#allocation6], 4294963200  ;;  %vm99_vm0 = vcmask 1043456   ;;  %vm95_vm1 = vcmask 31744   ;;  %v90_v0 = vld [vmem:[%s602_s2] sm:$0xf] }
   0xf   :  { %v131_v1 = vld [vmem:[%s603_s3] sm:$0xf]  ;;  %357 = vmatpush.msk.msra.mxu0 %vm99_vm0, %v90_v0  ;;  %v181_v4 = vld [vmem:[#allocation2 + $0x78] sm:$0xff]  ;;  %v180_v5 = vld [vmem:[#allocation2 + $0x70] sm:$0xff]  ;;  %vm287_vm2 = vcmask 1041409   ;;  %s481_s29 = smov [#allocation8]  }
  0x10   :  { %v565_v2 = vld [vmem:[%s600_s0] sm:$0x3]  ;;  %359 = vmatpush.msk.msra.mxu1 %vm99_vm0, %v131_v1  ;;  %186 = vmatpush.msra.mxu2 %v181_v4  ;;  %v179_v6 = vld [vmem:[#allocation2 + $0x68] sm:$0xff]  ;;  %v177_v9 = vld [vmem:[#allocation2 + $0x58] sm:$0xff]  ;;  %s344_s30 = sshll.u32 %s481_s29, 4  ;;  %s346_s15 = sshll.u32 %s612_s12, 4  ;;  %s345_s30 = int_to_ptr.vmem [resolvable:$true] %s344_s30  ;;  %s347_s15 = int_to_ptr.hbm [resolvable:$true] %s346_s15 }
  0x11   :  { %v129_v3 = vld [vmem:[%s601_s1] sm:$0xff]  ;;  %358 = vmatmul.msk.f32.vlgmr.msra.gmra.mxu0 %vm95_vm1, %v565_v2  ;;  %v130_v8 = vld [vmem:[%s601_s1 + $0x8] sm:$0xff]  ;;  %v176_v10 = vld [vmem:[#allocation2 + $0x50] sm:$0xff] }
  0x12   :  { %360 = vmatmul.msk.f32.vlgmr.msra.gmra.mxu1 %vm95_vm1, %v129_v3  ;;  %187 = vmatpush.msra.mxu2 %v180_v5  ;;  %v178_v7 = vld [vmem:[#allocation2 + $0x60] sm:$0xff]  ;;  %v175_v11 = vld [vmem:[#allocation2 + $0x48] sm:$0xff]  ;;  %v173_v13 = vld [vmem:[#allocation2 + $0x38] sm:$0xff] }
  0x13   :  { %v174_v12 = vld [vmem:[#allocation2 + $0x40] sm:$0xff]  ;;  %v172_v14 = vld [vmem:[#allocation2 + $0x30] sm:$0xff]  ;;  %v171_v15 = vld [vmem:[#allocation2 + $0x28] sm:$0xff] }
  0x14   :  { %188 = vmatpush.msra.mxu2 %v179_v6  ;;  %v170_v16 = vld [vmem:[#allocation2 + $0x20] sm:$0xff]  ;;  %v169_v17 = vld [vmem:[#allocation2 + $0x18] sm:$0xff]  ;;  %v168_v18 = vld [vmem:[#allocation2 + $0x10] sm:$0xff] }
  0x15   :  { %v167_v19 = vld [vmem:[#allocation2 + $0x8] sm:$0xff]  ;;  %v166_v20 = vld [vmem:[#allocation2] sm:$0xff]  ;;  %v226_v21 = vld [vmem:[#allocation5 + $0x78] sm:$0xff] }
  0x16   :  { %189 = vmatpush.msra.mxu2 %v178_v7  ;;  %v225_v22 = vld [vmem:[#allocation5 + $0x70] sm:$0xff]  ;;  %231 = vmatpush.msra.mxu3 %v226_v21  ;;  %v224_v23 = vld [vmem:[#allocation5 + $0x68] sm:$0xff]  ;;  %v223_v24 = vld [vmem:[#allocation5 + $0x60] sm:$0xff] }
  0x17   :  { %v222_v25 = vld [vmem:[#allocation5 + $0x58] sm:$0xff]  ;;  %v221_v26 = vld [vmem:[#allocation5 + $0x50] sm:$0xff]  ;;  %v220_v27 = vld [vmem:[#allocation5 + $0x48] sm:$0xff] }
  0x18   :  { %190 = vmatpush.msra.mxu2 %v177_v9  ;;  %232 = vmatpush.msra.mxu3 %v225_v22  ;;  %v370_v28 = vld [vmem:[%s604_s4] ss:$0 sm:$0xff]  ;;  %v218_v30 = vld [vmem:[#allocation5 + $0x38] sm:$0xff]  ;;  %v217_v34 = vld [vmem:[#allocation5 + $0x30] sm:$0xff] }
  0x19   :  { %v219_v29 = vld [vmem:[#allocation5 + $0x40] sm:$0xff]  ;;  %v216_v36 = vld [vmem:[#allocation5 + $0x28] sm:$0xff]  ;;  %v214_v41 = vld [vmem:[#allocation5 + $0x18] sm:$0xff] }
  0x1a   :  { %361 = vmatmul.msk.f32.gmra.mxu1 %vm95_vm1, %v130_v8  ;;  %191 = vmatpush.msra.mxu2 %v176_v10  ;;  %v215_v39 = vld [vmem:[#allocation5 + $0x20] sm:$0xff]  ;;  %v213_v46 = vld [vmem:[#allocation5 + $0x10] sm:$0xff]  ;;  %v212_v47 = vld [vmem:[#allocation5 + $0x8] sm:$0xff] }
  0x1b   :  { %233 = vmatpush.msra.mxu3 %v224_v23  ;;  %v211_v48 = vld [vmem:[#allocation5] sm:$0xff]  ;;  %v284_v49 = vld [vmem:[#allocation7 + $0x78] sm:$0xff]  ;;  %v283_v50 = vld [vmem:[#allocation7 + $0x70] sm:$0xff] }
  0x1c   :  { %192 = vmatpush.msra.mxu2 %v175_v11  ;;  %290 = vmatpush.msrb.mxu0 %v284_v49  ;;  %v282_v51 = vld [vmem:[#allocation7 + $0x68] sm:$0xff]  ;;  %v371_v52 = vld [vmem:[%s606_s6] ss:$0 sm:$0xff]  ;;  %v280_v60 = vld [vmem:[#allocation7 + $0x58] sm:$0xff] }
  0x1d   :  { %234 = vmatpush.msra.mxu3 %v223_v24  ;;  %v281_v59 = vld [vmem:[#allocation7 + $0x60] sm:$0xff]  ;;  %v279_v61 = vld [vmem:[#allocation7 + $0x50] sm:$0xff]  ;;  %v278_v62 = vld [vmem:[#allocation7 + $0x48] sm:$0xff] }
  0x1e   :  { %193 = vmatpush.msra.mxu2 %v174_v12  ;;  %291 = vmatpush.msrb.mxu0 %v283_v50  ;;  %v277_v63 = vld [vmem:[#allocation7 + $0x40] sm:$0xff]  ;;  %v276_v0 = vld [vmem:[#allocation7 + $0x38] sm:$0xff]  ;;  %v275_v1 = vld [vmem:[#allocation7 + $0x30] sm:$0xff] }
  0x1f   :  { %235 = vmatpush.msra.mxu3 %v222_v25  ;;  %v274_v3 = vld [vmem:[#allocation7 + $0x28] sm:$0xff]  ;;  %v273_v4 = vld [vmem:[#allocation7 + $0x20] sm:$0xff]  ;;  %v272_v5 = vld [vmem:[#allocation7 + $0x18] sm:$0xff] }
  0x20   :  { %194 = vmatpush.msra.mxu2 %v173_v13  ;;  %292 = vmatpush.msrb.mxu0 %v282_v51  ;;  %v271_v6 = vld [vmem:[#allocation7 + $0x10] sm:$0xff]  ;;  %v268_v7 = vld [vmem:[%s609_s9] sm:$0xf]  ;;  %v270_v8 = vld [vmem:[#allocation7 + $0x8] sm:$0xff] }
  0x21   :  { %236 = vmatpush.msra.mxu3 %v221_v26  ;;  %362 = vmatpush.msk.msrb.mxu1 %vm99_vm0, %v268_v7  ;;  %v269_v9 = vld [vmem:[#allocation7] sm:$0xff] }
  0x22   :  { %195 = vmatpush.msra.mxu2 %v172_v14  ;;  %293 = vmatpush.msrb.mxu0 %v281_v59  ;;  %v372_v10 = vld [vmem:[%s608_s8] ss:$0 sm:$0xff] }
  0x23   :  { %237 = vmatpush.msra.mxu3 %v220_v27  ;;  %363 = vmatmul.msk.f32.vlgmr.msrb.gmra.mxu1 %vm95_vm1, %v565_v2 }
  0x24   :  { %196 = vmatpush.msra.mxu2 %v171_v15  ;;  %294 = vmatpush.msrb.mxu0 %v280_v60 }
  0x25   :  { %238 = vmatpush.msra.mxu3 %v219_v29 }
  0x26   :  { %197 = vmatpush.msra.mxu2 %v170_v16  ;;  %295 = vmatpush.msrb.mxu0 %v279_v61 }
  0x27   :  { %239 = vmatpush.msra.mxu3 %v218_v30  ;;  %v373_v30 = vld [vmem:[%s611_s11] ss:$0 sm:$0xff] }
  0x28   :  { %198 = vmatpush.msra.mxu2 %v169_v17  ;;  %296 = vmatpush.msrb.mxu0 %v278_v62 }
  0x29   :  { %240 = vmatpush.msra.mxu3 %v217_v34 }
  0x2a   :  { %199 = vmatpush.msra.mxu2 %v168_v18  ;;  %297 = vmatpush.msrb.mxu0 %v277_v63 }
  0x2b   :  { %241 = vmatpush.msra.mxu3 %v216_v36 }
  0x2c   :  { %200 = vmatpush.msra.mxu2 %v167_v19  ;;  %298 = vmatpush.msrb.mxu0 %v276_v0 }
  0x2d   :  { %242 = vmatpush.msra.mxu3 %v215_v39 }
  0x2e   :  { %201 = vmatpush.msra.mxu2 %v166_v20  ;;  %299 = vmatpush.msrb.mxu0 %v275_v1 }
  0x2f   :  { %243 = vmatpush.msra.mxu3 %v214_v41 }
  0x30   :  { %300 = vmatpush.msrb.mxu0 %v274_v3 }
  0x31   :  { %244 = vmatpush.msra.mxu3 %v213_v46 }
  0x32   :  { %301 = vmatpush.msrb.mxu0 %v273_v4 }
  0x33   :  { %245 = vmatpush.msra.mxu3 %v212_v47 }
  0x34   :  { %302 = vmatpush.msrb.mxu0 %v272_v5 }
  0x35   :  { %246 = vmatpush.msra.mxu3 %v211_v48 }
  0x36   :  { %303 = vmatpush.msrb.mxu0 %v271_v6 }
  0x38   :  { %304 = vmatpush.msrb.mxu0 %v270_v8 }
  0x3a   :  { %305 = vmatpush.msrb.mxu0 %v269_v9 }
  0x8e   :  { %v120_v31 = vpop.f32.mrf.mxu0 }
  0x8f   :  { %v158_v32 = vpop.f32.mrf.mxu1  ;;  %v121_v33 = vadd.f32 %v370_v28, %v120_v31 }
  0x91   :  { %v125_v35 = vperm.slane %v121_v33, 0  ;;  %v124_v37 = vrot.slane %v121_v33, 1 }
  0x93   :  { %v159_v38 = vadd.f32 %v158_v32, %v125_v35  ;;  %v126_v43 = vperm.slane %v124_v37, 0 }
  0x95   :  { %v164_v40 = vmax.f32 %v159_v38, 0.0 }
  0x97   :  { %v161_v42 = vpop.f32.mrf.mxu1  ;;  %202 = vmatmul.f32.vlgmr.msra.gmra.mxu2 %v164_v40 }
  0x98   :  { %v162_v44 = vadd.f32 %v161_v42, %v126_v43 }
  0x9a   :  { %v165_v45 = vmax.f32 %v162_v44, 0.0 }
  0x9f   :  { %205 = vmatmul.f32.gmra.mxu2 %v165_v45 }
  0xa0   :  { %v330_v29 = vpop.f32.mrf.mxu1 }
 0x11a   :  { %v203_v53 = vpop.f32.mrf.mxu2 }
 0x11b   :  { %v204_v54 = vadd.f32 %v371_v52, %v203_v53 }
 0x11d   :  { %v209_v55 = vmax.f32 %v204_v54, 0.0 }
 0x11f   :  { %247 = vmatmul.f32.vlgmr.msra.gmra.mxu3 %v209_v55 }
 0x122   :  { %v206_v56 = vpop.f32.mrf.mxu2 }
 0x123   :  { %v207_v57 = vadd.f32 %v371_v52, %v206_v56 }
 0x125   :  { %v210_v58 = vmax.f32 %v207_v57, 0.0 }
 0x127   :  { %250 = vmatmul.f32.gmra.mxu3 %v210_v58 }
 0x1a2   :  { %v248_v11 = vpop.f32.mrf.mxu3 }
 0x1a3   :  { %v249_v12 = vadd.f32 %v372_v10, %v248_v11 }
 0x1a5   :  { %v254_v13 = vrot.slane %v249_v12, 4 }
 0x1a7   :  { %v255_v14 = vadd.f32 %v254_v13, %v249_v12 }
 0x1a9   :  { %v256_v15 = vrot.slane %v255_v14, 2 }
 0x1aa   :  { %v251_v16 = vpop.f32.mrf.mxu3 }
 0x1ab   :  { %v252_v17 = vadd.f32 %v372_v10, %v251_v16  ;;  %v257_v18 = vadd.f32 %v256_v15, %v255_v14 }
 0x1ad   :  { %v260_v19 = vrot.slane %v252_v17, 4  ;;  %v258_v21 = vrot.slane %v257_v18, 1 }
 0x1af   :  { %v261_v20 = vadd.f32 %v260_v19, %v252_v17  ;;  %v259_v24 = vadd.f32 %v258_v21, %v257_v18 }
 0x1b1   :  { %v262_v22 = vrot.slane %v261_v20, 2  ;;  %v266_v26 = vmul.f32 0.125, %v259_v24 }
 0x1b3   :  { %v263_v23 = vadd.f32 %v262_v22, %v261_v20 }
 0x1b5   :  { %v264_v2 = vrot.slane %v263_v23, 1 }
 0x1b7   :  { %v265_v25 = vadd.f32 %v264_v2, %v263_v23 }
 0x1b9   :  { %v267_v27 = vmul.f32 0.125, %v265_v25 }
 0x1bb   :  { %v288_v28 = vsel %vm287_vm2, %v267_v27, %v266_v26 }
 0x1bc   :  { %306 = vmatmul.f32.vlgmr.msrb.gmra.mxu0 %v288_v28 }
 0x239   :  { %v307_v31 = vpop.f32.mrf.mxu0 }
 0x23a   :  { %v331_v32 = vadd.f32 %v330_v29, %v307_v31 }
 0x23c   :  { %v337_v33 = vadd.f32 %v373_v30, %v331_v32 }
 0x23e   :  { %338 = vst [vmem:[#allocation8] sm:$0x3] %v337_v33 }
 0x23f   :  { %349 = dma.vmem_to_hbm [thread:$0]  %s345_s30, 32, %s347_s15, [#allocation4]  }
 0x240   :  { %474 = dma.done.wait [#allocation4], 32  }
 0x241   :  { %475 = vsyncadd [#allocation4], 4294967264 }
 0x242   :  { %354 = vsyncpa [#allocation3], 1 }
 0x243   :  { %355 = vsyncpa [#allocation6], 1 }
 0x244   :  { %356 = vsyncpa [#allocation4], 1 }

</bundles_post_ra>
